<compile_context>
chip_gen: v5e
topology: v5e:2x2
jax: 0.10.0
libtpu: 0.0.40
codegen_flags: <defaults>
</compile_context>

<pallas_src>
import functools
import math

import jax
import jax.numpy as jnp
from jax.experimental import pallas as pl
from jax.experimental.pallas import tpu as pltpu

_LANES = 128      # TPU vreg lane width
_SUBLANES = 8     # f32 sublane tile
# Largest W kept as a single lane tile in the general kernel; beyond this the
# W axis is tiled over an "arbitrary" grid axis with a running-max scratch.
_MAX_W_TILE = 4096


# --------------------------------------------------------------------------
# Small helpers
# --------------------------------------------------------------------------
def _max_identity(dtype):
    """Identity element of `max` for `dtype` (used for init / padding)."""
    dtype = jnp.dtype(dtype)
    if jnp.issubdtype(dtype, jnp.floating):
        return float("-inf")
    if jnp.issubdtype(dtype, jnp.integer):
        return int(jnp.iinfo(dtype).min)
    raise NotImplementedError(f"max identity for dtype {dtype}")


def _round_up(x, m):
    return ((x + m - 1) // m) * m


def _fold_width(w):
    """Smallest power of two >= w (for w <= 128 this divides 128)."""
    d = 1
    while d < w:
        d *= 2
    return d


@functools.lru_cache(maxsize=None)
def _vmem_budget_bytes() -> int:
    """Generation-aware double-buffered working-set budget."""
    cap = None
    try:
        info_fn = getattr(pltpu, "get_tpu_info", None)
        if info_fn is not None:
            cap = getattr(info_fn(), "vmem_capacity_bytes", None)
    except Exception:  # best-effort query; fall back below
        cap = None
    if not cap:
        cap = 64 << 20  # conservative: v7x has 64 MiB VMEM per TensorCore
    return int(min(24 << 20, max(8 << 20, cap // 3)))


def _compiler_params(dim_sem):
    # Budget already includes double buffering; add slack for pipeline
    # bookkeeping.  24 MiB + 8 MiB = 32 MiB, safe on v5e/v6e/v7x.
    return pltpu.CompilerParams(
        dimension_semantics=dim_sem,
        vmem_limit_bytes=_vmem_budget_bytes() + (8 << 20),
    )


def _block_rows(nrows, in_row_bytes, out_row_bytes, itemsize):
    """Row tile: as large as the VMEM budget allows, dtype-aligned sublanes."""
    align = _SUBLANES * max(1, 4 // max(1, itemsize))  # 8 f32, 16 bf16, 32 i8
    per_row = 2 * (in_row_bytes + out_row_bytes)       # 2x: double buffering
    tr = max(align, _vmem_budget_bytes() // per_row)
    tr = int(min(tr, nrows))
    if tr < nrows:
        tr = max(align, (tr // align) * align)
    return tr


@functools.lru_cache(maxsize=None)
def _roll_is_jnp_roll() -> bool:
    """One-time probe: True iff pltpu.roll(x, s, axis)[l] == x[l - s]."""
    def probe(x_ref, o_ref):
        o_ref[...] = pltpu.roll(x_ref[...], shift=1, axis=1)

    x = jax.lax.broadcasted_iota(jnp.int32, (_SUBLANES, _LANES), 1)
    out = pl.pallas_call(
        probe,
        out_shape=jax.ShapeDtypeStruct((_SUBLANES, _LANES), jnp.int32),
    )(x)
    return int(out[0, 0]) == _LANES - 1


# --------------------------------------------------------------------------
# Kernels
# --------------------------------------------------------------------------
def _folded_max_kernel(x_ref, o_ref, *, w, g, hi_lane):
    """x_ref: (TR, 128) lane-dense; each row packs g groups of w lanes.

    Roll-tree: after maxing with rolls of 1, 2, ..., w/2, every lane holds the
    max over a length-w window ending (hi_lane=True) or starting
    (hi_lane=False) at that lane; group maxes then sit at the last (resp.
    first) lane of each aligned w-lane group and are extracted with g
    single-lane slices.
    """
    x = x_ref[...]
    if g == 1:
        o_ref[...] = jnp.max(x, axis=-1, keepdims=True)
        return
    y = x
    s = 1
    while s < w:
        y = jnp.maximum(y, pltpu.roll(y, shift=s, axis=1))
        s *= 2
    base = w - 1 if hi_lane else 0
    parts = [y[:, base + k * w: base + k * w + 1] for k in range(g)]  # (TR,1)
    o_ref[...] = jnp.concatenate(parts, axis=-1)


def _tiled_max_kernel(x_ref, o_ref, acc_ref, *, w_total, w_tile, identity,
                      need_mask):
    """General path: (TR, w_tile) blocks, running max in VMEM scratch."""
    k = pl.program_id(1)
    nk = pl.num_programs(1)

    @pl.when(k == 0)
    def _init():
        acc_ref[...] = jnp.full(acc_ref.shape, identity, dtype=acc_ref.dtype)

    x = x_ref[...]
    if need_mask:  # ragged last W tile: ignore out-of-bounds lanes
        col = jax.lax.broadcasted_iota(jnp.int32, x.shape, 1) + k * w_tile
        x = jnp.where(col < w_total, x, jnp.asarray(identity, dtype=x.dtype))
    acc_ref[...] = jnp.maximum(acc_ref[...],
                               jnp.max(x, axis=-1, keepdims=True))

    @pl.when(k == nk - 1)
    def _done():
        o_ref[...] = acc_ref[...]


# --------------------------------------------------------------------------
# Wrappers
# --------------------------------------------------------------------------
def _max_folded(x2, rows, W, w_pad):
    """W <= 128: fold 128 // w_pad rows per dense 128-lane VMEM row."""
    dt = x2.dtype
    G = _LANES // w_pad
    pad_w = w_pad - W
    pad_rows = (-rows) % G
    if pad_w or pad_rows:
        x2 = jnp.pad(x2, ((0, pad_rows), (0, pad_w)),
                     constant_values=_max_identity(dt))
    n = (rows + pad_rows) // G
    xf = x2.reshape(n, _LANES)                 # free, row-major reshape

    tr = _block_rows(n, _LANES * dt.itemsize, _LANES * dt.itemsize,
                     dt.itemsize)
    grid = (pl.cdiv(n, tr),)
    out = pl.pallas_call(
        functools.partial(_folded_max_kernel, w=w_pad, g=G,
                          hi_lane=_roll_is_jnp_roll()),
        out_shape=jax.ShapeDtypeStruct((n, G), dt),
        grid_spec=pltpu.PrefetchScalarGridSpec(
            num_scalar_prefetch=0,
            grid=grid,
            in_specs=[pl.BlockSpec((tr, _LANES), lambda i: (i, 0))],
            out_specs=pl.BlockSpec((tr, G), lambda i: (i, 0)),
        ),
        compiler_params=_compiler_params(("parallel",)),
        cost_estimate=pl.CostEstimate(
            flops=n * _LANES, transcendentals=0,
            bytes_accessed=(n * _LANES + n * G) * dt.itemsize),
    )(xf)
    out = out.reshape(n * G)
    if pad_rows:
        out = out[:rows]
    return out


def _max_general(x2, rows, W):
    """W > 128 (or 64 < W < 128 non-divisors): tiled over the W axis."""
    dt = x2.dtype
    identity = _max_identity(dt)
    if _round_up(W, _LANES) <= _MAX_W_TILE:
        w_tile, w_steps, need_mask = W, 1, False      # whole axis in one tile
    else:
        w_tile = _MAX_W_TILE                          # multiple of 128
        w_steps = pl.cdiv(W, w_tile)
        need_mask = (W % w_tile) != 0
    in_row_bytes = _round_up(w_tile, _LANES) * dt.itemsize
    tr = _block_rows(rows, in_row_bytes, _LANES * dt.itemsize, dt.itemsize)
    grid = (pl.cdiv(rows, tr), w_steps)
    out = pl.pallas_call(
        functools.partial(_tiled_max_kernel, w_total=W, w_tile=w_tile,
                          identity=identity, need_mask=need_mask),
        out_shape=jax.ShapeDtypeStruct((rows, 1), dt),
        grid_spec=pltpu.PrefetchScalarGridSpec(
            num_scalar_prefetch=0,
            grid=grid,
            in_specs=[pl.BlockSpec((tr, w_tile), lambda i, k: (i, k))],
            out_specs=pl.BlockSpec((tr, 1), lambda i, k: (i, 0)),
            scratch_shapes=[pltpu.VMEM((tr, 1), dt)],
        ),
        compiler_params=_compiler_params(("parallel", "arbitrary")),
        cost_estimate=pl.CostEstimate(
            flops=rows * W, transcendentals=0,
            bytes_accessed=(rows * W + rows) * dt.itemsize),
    )(x2)
    return out.reshape(rows)


def max_layer(x: jax.Array) -> jax.Array:
    """Pallas TPU implementation of MaxLayer.forward: max over the last axis."""
    if x.ndim == 0:
        raise ValueError("max over dim=-1 needs at least one dimension")
    if x.dtype == jnp.bool_:  # bool max == logical-or; compute in int32
        return max_layer(x.astype(jnp.int32)).astype(jnp.bool_)

    orig_shape = x.shape
    W = int(orig_shape[-1])
    lead = orig_shape[:-1]
    rows = int(math.prod(lead)) if lead else 1

    if W == 0:
        raise ValueError("cannot take max over an empty axis")
    if W == 1:                      # max over a singleton axis is the identity
        return x.reshape(lead)
    if rows == 0:                   # empty leading dims -> empty result
        return jnp.zeros(lead, dtype=x.dtype)

    x2 = x.reshape(rows, W)
    if W <= _LANES:
        w_pad = _fold_width(W)      # smallest divisor of 128 that is >= W
        if _LANES % W == 0 or w_pad <= 64:
            # Dense lane-folded path (pads W only when it does not divide 128,
            # and pads at most G-1 rows).
            out = _max_folded(x2, rows, W, w_pad)
        else:
            # 64 < W < 128 non-divisors: padding to 128 would double traffic;
            # single-tile general path is cheaper.
            out = _max_general(x2, rows, W)
    else:
        out = _max_general(x2, rows, W)
    return out.reshape(lead)


if __name__ == "__main__":
    key = jax.random.PRNGKey(0)
    ks = jax.random.split(key, 5)

    cases = [
        # NCHW-style input from the module's typical usage: folded fast path
        # (W=16 divides 128, G=8, no padding).
        ("folded_W_divides_128", jax.random.normal(ks[0], (2, 4, 16, 16),
                                                   dtype=jnp.float32)),
        # W does not divide 128: padded to 64 lanes, folded path (G=2).
        ("folded_padded_W", jax.random.normal(ks[1], (2, 3, 37),
                                              dtype=jnp.float32)),
        # rows not a multiple of G: row padding path.
        ("folded_padded_rows", jax.random.normal(ks[2], (3, 16),
                                                 dtype=jnp.float32)),
        # W > 128, single W tile: general path.
        ("general_single_tile", jax.random.normal(ks[3], (2, 300),
                                                  dtype=jnp.float32)),
        # W > _MAX_W_TILE: general path with running-max scratch + ragged mask.
        ("general_tiled_W", jax.random.normal(ks[4], (2, 5000),
                                              dtype=jnp.float32)),
    ]

    for name, xin in cases:
        out = max_layer(xin)
        jax.block_until_ready(out)
        ref = jnp.max(xin, axis=-1)
        assert out.shape == ref.shape, (name, out.shape, ref.shape)
        assert bool(jnp.array_equal(out, ref)), f"{name}: mismatch vs reference"

    print("KERNEL_OK")
</pallas_src>

<mosaic_0001>
module attributes {stable_mosaic.version = 11 : i64} {
  func.func @probe(%arg0: memref<8x128xi32, #tpu.memory_space<vmem>>, %arg1: memref<8x128xi32, #tpu.memory_space<vmem>>) attributes {dimension_semantics = [], scalar_prefetch = 0 : i64, scratch_operands = 0 : i64, tpu.core_type = #tpu.core_type<tc>} {
    %c0 = arith.constant 0 : index
    %c0_0 = arith.constant 0 : index
    %0 = vector.load %arg0[%c0, %c0_0] : memref<8x128xi32, #tpu.memory_space<vmem>>, vector<8x128xi32>
    %c1_i32 = arith.constant 1 : i32
    %1 = tpu.dynamic_rotate %0 by %c1_i32 dim 1 : vector<8x128xi32>, i32 -> vector<8x128xi32>
    %c0_1 = arith.constant 0 : index
    %c0_2 = arith.constant 0 : index
    %2 = vector.load %arg1[%c0_1, %c0_2] : memref<8x128xi32, #tpu.memory_space<vmem>>, vector<8x128xi32>
    tpu.vector_store %arg1[%c0_1, %c0_2], %1 {strides = array<i32>} : memref<8x128xi32, #tpu.memory_space<vmem>>, vector<8x128xi32>,
    return
  }
}

</mosaic_0001>

<bundles_post_ra>
// kernel: tpu_custom_call.1
= control target key start
LH: loop header
LB: loop body
LE: loop exit
PB: predicated region body
PF: predicated region fallthrough
CT: control target
= control target key end

     0   :  { %6 = vsyncpa [#allocation3], 0  ;;  %s118_s0 = inlined_call_operand.hbm [shape: s32[8,128], index: 0, kind: input, shape index: {}]   ;;  %s119_s1 = inlined_call_operand.hbm [shape: s32[8,128], index: 1, kind: output, shape index: {}]  }
   0x1   :  { %7 = vsyncpa [#allocation4], 0  ;;  %s13_s8 = sshll.u32 %s118_s0, 4  ;;  %s99_s9 = smov [#allocation2]   ;;  %s14_s8 = int_to_ptr.hbm [resolvable:$true] %s13_s8 }
   0x2   :  { %s15_s10 = sshll.u32 %s99_s9, 4  ;;  %s16_s10 = int_to_ptr.vmem [resolvable:$true] %s15_s10 }
   0x3   :  { %18 = dma.hbm_to_vmem [thread:$0]  %s14_s8, 128, %s16_s10, [#allocation3]  }
   0x4   :  { %95 = dma.done.wait [#allocation3], 128  }
   0x5   :  { %96 = vsyncadd [#allocation3], 4294967168  ;;  %v23_v0 = vld [vmem:[#allocation2] sm:$0xff]  ;;  %s100_s11 = smov 1   ;;  %s101_s12 = smov [#allocation5]  }
   0x6   :  { %24 = vrot.lane.b32.xlu0 %v23_v0, %s100_s11  ;;  %s32_s13 = sshll.u32 %s101_s12, 4  ;;  %s34_s16 = sshll.u32 %s119_s1, 4  ;;  %s33_s13 = int_to_ptr.vmem [resolvable:$true] %s32_s13  ;;  %s35_s16 = int_to_ptr.hbm [resolvable:$true] %s34_s16 }
  0x78   :  { %v25_v1 = vpop.permute.xlu0 %24 }
  0x79   :  { %26 = vst [vmem:[#allocation5] sm:$0xff] %v25_v1 }
  0x7a   :  { %37 = dma.vmem_to_hbm [thread:$0]  %s33_s13, 128, %s35_s16, [#allocation4]  }
  0x7b   :  { %97 = dma.done.wait [#allocation4], 128  }
  0x7c   :  { %98 = vsyncadd [#allocation4], 4294967168 }
  0x7d   :  { %42 = vsyncpa [#allocation3], 1 }
  0x7e   :  { %43 = vsyncpa [#allocation4], 1 }

</bundles_post_ra>
